<compile_context>
chip_gen: v5e
topology: v5e:2x2
jax: 0.10.0
libtpu: 0.0.40
codegen_flags: <defaults>
</compile_context>

<pallas_src>
import jax
import jax.numpy as jnp
from jax.experimental import pallas as pl
from jax.experimental.pallas import tpu as pltpu


def _round_up(x, m):
    return ((x + m - 1) // m) * m


def _fc_kernel(x_ref, w1_ref, b1_ref, w2_ref, b2_ref, cmask_ref, o_ref):
    # Hidden layer: Linear -> ReLU.  bf16 MXU operands, f32 accumulation; the
    # f32 -> bf16 cast of x happens here (VPU slack) instead of in HBM.
    x = x_ref[...].astype(jnp.bfloat16)
    h = jnp.dot(x, w1_ref[...], preferred_element_type=jnp.float32) + b1_ref[...]
    h = jnp.maximum(h, 0.0)

    # Output layer: Linear -> ReLU.
    y = jnp.dot(h.astype(jnp.bfloat16), w2_ref[...],
                preferred_element_type=jnp.float32) + b2_ref[...]
    y = jnp.maximum(y, 0.0)

    # log_softmax over classes.  cmask is 0 on real class lanes and -inf on
    # padded lanes, so padding never perturbs the max / sum.  Padded lanes end
    # up -inf in the output and are sliced away by the wrapper.
    ym = y + cmask_ref[...]
    m = jnp.max(ym, axis=1, keepdims=True)
    s = ym - m
    lse = jnp.log(jnp.sum(jnp.exp(s), axis=1, keepdims=True))
    o_ref[...] = (s - lse).astype(o_ref.dtype)


def prepare_params(w1, b1, w2, b2):
    """One-time padding / bf16 casting of weights (hoisted out of fc_forward)."""
    D, H = w1.shape
    _, C = w2.shape
    Hp = _round_up(H, 128)
    Cp = _round_up(C, 128)
    w1p = jnp.zeros((D, Hp), jnp.bfloat16).at[:, :H].set(w1.astype(jnp.bfloat16))
    b1p = jnp.zeros((1, Hp), jnp.float32).at[0, :H].set(b1.astype(jnp.float32))
    w2p = jnp.zeros((Hp, Cp), jnp.bfloat16).at[:H, :C].set(w2.astype(jnp.bfloat16))
    b2p = jnp.zeros((1, Cp), jnp.float32).at[0, :C].set(b2.astype(jnp.float32))
    cmask = jnp.where(jnp.arange(Cp) < C, 0.0, -jnp.inf).astype(jnp.float32)
    cmask = cmask.reshape(1, Cp)
    return {"w1": w1p, "b1": b1p, "w2": w2p, "b2": b2p, "cmask": cmask,
            "dims": (D, H, C)}


def _build_call(TB, Bp, D, Hp, Cp, *, single_buffer_weights, vmem_limit, cost):
    # Constant-index resident operands: single-buffer them if supported.
    resident = ({"pipeline_mode": pl.Buffered(1)}
                if single_buffer_weights else {})
    return pl.pallas_call(
        _fc_kernel,
        out_shape=jax.ShapeDtypeStruct((Bp, Cp), jnp.float32),
        grid=(Bp // TB,),
        in_specs=[
            pl.BlockSpec((TB, D), lambda i: (i, 0)),               # x: batch-tiled (f32)
            pl.BlockSpec((D, Hp), lambda i: (0, 0), **resident),   # w1: VMEM-resident
            pl.BlockSpec((1, Hp), lambda i: (0, 0), **resident),   # b1: VMEM-resident
            pl.BlockSpec((Hp, Cp), lambda i: (0, 0), **resident),  # w2: VMEM-resident
            pl.BlockSpec((1, Cp), lambda i: (0, 0), **resident),   # b2: VMEM-resident
            pl.BlockSpec((1, Cp), lambda i: (0, 0), **resident),   # class mask
        ],
        out_specs=pl.BlockSpec((TB, Cp), lambda i: (i, 0)),
        compiler_params=pltpu.CompilerParams(
            dimension_semantics=("parallel",),
            vmem_limit_bytes=vmem_limit),
        cost_estimate=cost,
    )


def fc_forward(x, params, batch_size, *, block_b=512):
    # TODO(synk): reference forward calls F.log_softmax(self.model(x), dim=1)
    # where self.model is an nn.ModuleList (not callable); the intended
    # semantics (log_softmax of the looped-layer output, which includes the
    # final ReLU) are implemented here.
    if x.ndim == 4:
        x = x.reshape(batch_size, -1)   # same row-major flatten as torch .view
    x = x.astype(jnp.float32)
    B, D = x.shape
    Dw, H, C = params["dims"]
    assert D == Dw, "input feature size does not match prepared params"
    w1p, b1p, w2p, b2p, cmask = (params["w1"], params["b1"], params["w2"],
                                 params["b2"], params["cmask"])
    Hp, Cp = w1p.shape[1], w2p.shape[1]

    # Batch tiling: the sublane (M) dim only needs 8/16-row alignment, not 128.
    # Aim for >=2 grid steps when B > 16 so the "parallel" axis actually shards
    # across v7x's two TensorCores (no-op on v5e/v6e single-TC chips).
    block_b = max(16, _round_up(block_b, 16))
    nsteps = max(1, -(-B // block_b))
    if B > 16:
        nsteps = max(nsteps, 2)
    TB = _round_up(-(-B // nsteps), 16)
    Bp = TB * nsteps
    xp = x if Bp == B else jnp.pad(x, ((0, Bp - B), (0, 0)))

    # Resident-weight VMEM footprint + double-buffered activation tiles.
    # TODO(synk): add a K-tiled fallback (extra "arbitrary" grid axis over D
    # with an f32 accumulator scratch + pl.when init/finalize) when resident
    # weights outgrow the VMEM budget (threshold on v7x's 64 MiB is ~half
    # that of v5e/v6e's 128 MiB).
    wbytes = ((w1p.size + w2p.size) * 2
              + (b1p.size + b2p.size + cmask.size) * 4)

    def vmem_limit(weight_bufs):
        need = (weight_bufs * wbytes
                + 2 * TB * D * 4        # double-buffered x tiles (f32)
                + 2 * TB * Cp * 4       # double-buffered output tiles (f32)
                + TB * Hp * 4           # hidden activation / spill headroom
                + (2 << 20))            # misc headroom
        return int(min(64 << 20, max(16 << 20, need)))

    # CostEstimate on true (not padded) shapes; log counted as transcendental.
    cost = pl.CostEstimate(
        flops=2 * B * (D * H + H * C) + 2 * B * (H + C),
        transcendentals=B * (C + 1),
        bytes_accessed=(B * D * 4 + D * H * 2 + H * C * 2
                        + (H + C) * 4 + B * C * 4),
    )

    operands = (xp, w1p, b1p, w2p, b2p, cmask)
    try:
        out = _build_call(TB, Bp, D, Hp, Cp, single_buffer_weights=True,
                          vmem_limit=vmem_limit(1), cost=cost)(*operands)
    except Exception:
        # Older Pallas/Mosaic versions may reject pl.Buffered(1) on pipelined
        # inputs; fall back to default double buffering (identical results,
        # just more resident VMEM).
        out = _build_call(TB, Bp, D, Hp, Cp, single_buffer_weights=False,
                          vmem_limit=vmem_limit(2), cost=cost)(*operands)

    return out[:B, :C]


def init_params(key, input_size, hidden_size, num_classes):
    # nn.Linear-shaped params, stored transposed as (in, hidden) / (hidden, classes).
    k1, k2, k3, k4 = jax.random.split(key, 4)
    if isinstance(input_size, (tuple, list)):
        d_in = 1
        for s in input_size:
            d_in *= int(s)
    else:
        d_in = int(input_size)
    lim1 = 1.0 / (d_in ** 0.5)
    lim2 = 1.0 / (hidden_size ** 0.5)
    w1 = jax.random.uniform(k1, (d_in, hidden_size), jnp.float32, -lim1, lim1)
    b1 = jax.random.uniform(k2, (hidden_size,), jnp.float32, -lim1, lim1)
    w2 = jax.random.uniform(k3, (hidden_size, num_classes), jnp.float32, -lim2, lim2)
    b2 = jax.random.uniform(k4, (num_classes,), jnp.float32, -lim2, lim2)
    return w1, b1, w2, b2


if __name__ == "__main__":
    batch_size = 2
    input_size = (4, 8, 8)   # C, H, W -> flattened to 256
    hidden_size = 32
    num_classes = 10

    key = jax.random.PRNGKey(0)
    kx, kp = jax.random.split(key)
    x = jax.random.normal(kx, (batch_size,) + input_size, jnp.float32)  # NCHW
    w1, b1, w2, b2 = init_params(kp, input_size, hidden_size, num_classes)

    # One-time prep of padded / bf16 weights (hoisted out of the forward path).
    params = prepare_params(w1, b1, w2, b2)

    out = fc_forward(x, params, batch_size)
    jax.block_until_ready(out)

    assert out.shape == (batch_size, num_classes)

    # sanity 1: log_softmax rows exp-sum to ~1
    rowsum = jnp.sum(jnp.exp(out), axis=1)
    assert bool(jnp.all(jnp.abs(rowsum - 1.0) < 1e-3))

    # sanity 2: matches a pure-JAX f32 reference at bf16-appropriate tolerance
    xr = x.reshape(batch_size, -1)
    h_ref = jnp.maximum(xr @ w1 + b1, 0.0)
    y_ref = jnp.maximum(h_ref @ w2 + b2, 0.0)
    ref = jax.nn.log_softmax(y_ref, axis=1)
    assert bool(jnp.all(jnp.abs(out - ref) < 5e-2))

    print("KERNEL_OK")
</pallas_src>

<mosaic_0001>
module attributes {stable_mosaic.version = 11 : i64} {
  func.func @_fc_kernel(%arg0: i32, %arg1: memref<16x256xf32, #tpu.memory_space<vmem>>, %arg2: memref<256x128xbf16, #tpu.memory_space<vmem>>, %arg3: memref<1x128xf32, #tpu.memory_space<vmem>>, %arg4: memref<128x128xbf16, #tpu.memory_space<vmem>>, %arg5: memref<1x128xf32, #tpu.memory_space<vmem>>, %arg6: memref<1x128xf32, #tpu.memory_space<vmem>>, %arg7: memref<16x128xf32, #tpu.memory_space<vmem>>) attributes {dimension_semantics = [#tpu.dimension_semantics<parallel>], iteration_bounds = array<i64: 1>, scalar_prefetch = 0 : i64, scratch_operands = 0 : i64, tpu.core_type = #tpu.core_type<tc>, window_params = [{transform_indices = @transform_0, window_bounds = array<i64: 16, 256>}, {pipeline_mode = #tpu.pipeline_mode<synchronous>, transform_indices = @transform_1, window_bounds = array<i64: 256, 128>}, {pipeline_mode = #tpu.pipeline_mode<synchronous>, transform_indices = @transform_2, window_bounds = array<i64: 1, 128>}, {pipeline_mode = #tpu.pipeline_mode<synchronous>, transform_indices = @transform_3, window_bounds = array<i64: 128, 128>}, {pipeline_mode = #tpu.pipeline_mode<synchronous>, transform_indices = @transform_4, window_bounds = array<i64: 1, 128>}, {pipeline_mode = #tpu.pipeline_mode<synchronous>, transform_indices = @transform_5, window_bounds = array<i64: 1, 128>}, {transform_indices = @transform_6, window_bounds = array<i64: 16, 128>}]} {
    %c0 = arith.constant 0 : index
    %c0_0 = arith.constant 0 : index
    %0 = vector.load %arg1[%c0, %c0_0] : memref<16x256xf32, #tpu.memory_space<vmem>>, vector<16x256xf32>
    %1 = arith.truncf %0 : vector<16x256xf32> to vector<16x256xbf16>
    %c0_1 = arith.constant 0 : index
    %c0_2 = arith.constant 0 : index
    %2 = vector.load %arg2[%c0_1, %c0_2] : memref<256x128xbf16, #tpu.memory_space<vmem>>, vector<256x128xbf16>
    %cst = arith.constant dense<0.000000e+00> : vector<16x128xf32>
    %3 = tpu.matmul %1, %2, %cst {dimension_numbers = #tpu.dot_dimension_numbers<[1], [0], [0], [1], [0, 0, 1, 1], [], []>} : vector<16x256xbf16>, vector<256x128xbf16>, vector<16x128xf32> -> vector<16x128xf32>
    %c0_3 = arith.constant 0 : index
    %c0_4 = arith.constant 0 : index
    %4 = vector.load %arg3[%c0_3, %c0_4] : memref<1x128xf32, #tpu.memory_space<vmem>>, vector<1x128xf32>
    %5 = vector.broadcast %4 : vector<1x128xf32> to vector<16x128xf32>
    %6 = arith.addf %3, %5 : vector<16x128xf32>
    %cst_5 = arith.constant 0.000000e+00 : f32
    %7 = vector.broadcast %cst_5 : f32 to vector<16x128xf32>
    %8 = arith.maximumf %6, %7 : vector<16x128xf32>
    %9 = arith.truncf %8 : vector<16x128xf32> to vector<16x128xbf16>
    %c0_6 = arith.constant 0 : index
    %c0_7 = arith.constant 0 : index
    %10 = vector.load %arg4[%c0_6, %c0_7] : memref<128x128xbf16, #tpu.memory_space<vmem>>, vector<128x128xbf16>
    %cst_8 = arith.constant dense<0.000000e+00> : vector<16x128xf32>
    %11 = tpu.matmul %9, %10, %cst_8 {dimension_numbers = #tpu.dot_dimension_numbers<[1], [0], [0], [1], [0, 0, 1, 1], [], []>} : vector<16x128xbf16>, vector<128x128xbf16>, vector<16x128xf32> -> vector<16x128xf32>
    %c0_9 = arith.constant 0 : index
    %c0_10 = arith.constant 0 : index
    %12 = vector.load %arg5[%c0_9, %c0_10] : memref<1x128xf32, #tpu.memory_space<vmem>>, vector<1x128xf32>
    %13 = vector.broadcast %12 : vector<1x128xf32> to vector<16x128xf32>
    %14 = arith.addf %11, %13 : vector<16x128xf32>
    %cst_11 = arith.constant 0.000000e+00 : f32
    %15 = vector.broadcast %cst_11 : f32 to vector<16x128xf32>
    %16 = arith.maximumf %14, %15 : vector<16x128xf32>
    %c0_12 = arith.constant 0 : index
    %c0_13 = arith.constant 0 : index
    %17 = vector.load %arg6[%c0_12, %c0_13] : memref<1x128xf32, #tpu.memory_space<vmem>>, vector<1x128xf32>
    %18 = vector.broadcast %17 : vector<1x128xf32> to vector<16x128xf32>
    %19 = arith.addf %16, %18 : vector<16x128xf32>
    %cst_14 = arith.constant dense<0xFF800000> : vector<16xf32>
    %20 = vector.multi_reduction <maximumf>, %19, %cst_14 [1] : vector<16x128xf32> to vector<16xf32>
    %21 = vector.shape_cast %20 : vector<16xf32> to vector<16x1xf32>
    %22 = vector.broadcast %21 : vector<16x1xf32> to vector<16x128xf32>
    %23 = arith.subf %19, %22 : vector<16x128xf32>
    %24 = math.exp %23 : vector<16x128xf32>
    %cst_15 = arith.constant dense<0.000000e+00> : vector<16xf32>
    %25 = vector.multi_reduction <add>, %24, %cst_15 [1] : vector<16x128xf32> to vector<16xf32>
    %26 = vector.shape_cast %25 : vector<16xf32> to vector<16x1xf32>
    %27 = math.log %26 : vector<16x1xf32>
    %28 = vector.broadcast %27 : vector<16x1xf32> to vector<16x128xf32>
    %29 = arith.subf %23, %28 : vector<16x128xf32>
    %c0_16 = arith.constant 0 : index
    %c0_17 = arith.constant 0 : index
    %30 = vector.load %arg7[%c0_16, %c0_17] : memref<16x128xf32, #tpu.memory_space<vmem>>, vector<16x128xf32>
    tpu.vector_store %arg7[%c0_16, %c0_17], %29 {strides = array<i32>} : memref<16x128xf32, #tpu.memory_space<vmem>>, vector<16x128xf32>,
    return
  }
  func.func @transform_0(%arg0: i32) -> (i32, i32) {
    %c0_i32 = arith.constant 0 : i32
    %c0_i32_0 = arith.constant 0 : i32
    return %arg0, %c0_i32 : i32, i32
  }
  func.func @transform_1(%arg0: i32) -> (i32, i32) {
    %c0_i32 = arith.constant 0 : i32
    %c0_i32_0 = arith.constant 0 : i32
    %c0_i32_1 = arith.constant 0 : i32
    return %c0_i32, %c0_i32_0 : i32, i32
  }
  func.func @transform_2(%arg0: i32) -> (i32, i32) {
    %c0_i32 = arith.constant 0 : i32
    %c0_i32_0 = arith.constant 0 : i32
    %c0_i32_1 = arith.constant 0 : i32
    return %c0_i32, %c0_i32_0 : i32, i32
  }
  func.func @transform_3(%arg0: i32) -> (i32, i32) {
    %c0_i32 = arith.constant 0 : i32
    %c0_i32_0 = arith.constant 0 : i32
    %c0_i32_1 = arith.constant 0 : i32
    return %c0_i32, %c0_i32_0 : i32, i32
  }
  func.func @transform_4(%arg0: i32) -> (i32, i32) {
    %c0_i32 = arith.constant 0 : i32
    %c0_i32_0 = arith.constant 0 : i32
    %c0_i32_1 = arith.constant 0 : i32
    return %c0_i32, %c0_i32_0 : i32, i32
  }
  func.func @transform_5(%arg0: i32) -> (i32, i32) {
    %c0_i32 = arith.constant 0 : i32
    %c0_i32_0 = arith.constant 0 : i32
    %c0_i32_1 = arith.constant 0 : i32
    return %c0_i32, %c0_i32_0 : i32, i32
  }
  func.func @transform_6(%arg0: i32) -> (i32, i32) {
    %c0_i32 = arith.constant 0 : i32
    %c0_i32_0 = arith.constant 0 : i32
    return %arg0, %c0_i32 : i32, i32
  }
}

module attributes {stable_mosaic.version = 11 : i64} {
  func.func @_fc_kernel(%arg0: i32, %arg1: memref<16x256xf32, #tpu.memory_space<vmem>>, %arg2: memref<256x128xbf16, #tpu.memory_space<vmem>>, %arg3: memref<1x128xf32, #tpu.memory_space<vmem>>, %arg4: memref<128x128xbf16, #tpu.memory_space<vmem>>, %arg5: memref<1x128xf32, #tpu.memory_space<vmem>>, %arg6: memref<1x128xf32, #tpu.memory_space<vmem>>, %arg7: memref<16x128xf32, #tpu.memory_space<vmem>>) attributes {dimension_semantics = [#tpu.dimension_semantics<parallel>], iteration_bounds = array<i64: 1>, scalar_prefetch = 0 : i64, scratch_operands = 0 : i64, tpu.core_type = #tpu.core_type<tc>, window_params = [{transform_indices = @transform_0, window_bounds = array<i64: 16, 256>}, {pipeline_mode = #tpu.pipeline_mode<synchronous>, transform_indices = @transform_1, window_bounds = array<i64: 256, 128>}, {pipeline_mode = #tpu.pipeline_mode<synchronous>, transform_indices = @transform_2, window_bounds = array<i64: 1, 128>}, {pipeline_mode = #tpu.pipeline_mode<synchronous>, transform_indices = @transform_3, window_bounds = array<i64: 128, 128>}, {pipeline_mode = #tpu.pipeline_mode<synchronous>, transform_indices = @transform_4, window_bounds = array<i64: 1, 128>}, {pipeline_mode = #tpu.pipeline_mode<synchronous>, transform_indices = @transform_5, window_bounds = array<i64: 1, 128>}, {transform_indices = @transform_6, window_bounds = array<i64: 16, 128>}]} {
    %c0 = arith.constant 0 : index
    %c0_0 = arith.constant 0 : index
    %0 = vector.load %arg1[%c0, %c0_0] : memref<16x256xf32, #tpu.memory_space<vmem>>, vector<16x256xf32>
    %1 = arith.truncf %0 : vector<16x256xf32> to vector<16x256xbf16>
    %c0_1 = arith.constant 0 : index
    %c0_2 = arith.constant 0 : index
    %2 = vector.load %arg2[%c0_1, %c0_2] : memref<256x128xbf16, #tpu.memory_space<vmem>>, vector<256x128xbf16>
    %cst = arith.constant dense<0.000000e+00> : vector<16x128xf32>
    %3 = tpu.matmul %1, %2, %cst {dimension_numbers = #tpu.dot_dimension_numbers<[1], [0], [0], [1], [0, 0, 1, 1], [], []>} : vector<16x256xbf16>, vector<256x128xbf16>, vector<16x128xf32> -> vector<16x128xf32>
    %c0_3 = arith.constant 0 : index
    %c0_4 = arith.constant 0 : index
    %4 = vector.load %arg3[%c0_3, %c0_4] : memref<1x128xf32, #tpu.memory_space<vmem>>, vector<1x128xf32>
    %5 = vector.broadcast %4 : vector<1x128xf32> to vector<16x128xf32>
    %6 = arith.addf %3, %5 : vector<16x128xf32>
    %cst_5 = arith.constant 0.000000e+00 : f32
    %7 = vector.broadcast %cst_5 : f32 to vector<16x128xf32>
    %8 = arith.maximumf %6, %7 : vector<16x128xf32>
    %9 = arith.truncf %8 : vector<16x128xf32> to vector<16x128xbf16>
    %c0_6 = arith.constant 0 : index
    %c0_7 = arith.constant 0 : index
    %10 = vector.load %arg4[%c0_6, %c0_7] : memref<128x128xbf16, #tpu.memory_space<vmem>>, vector<128x128xbf16>
    %cst_8 = arith.constant dense<0.000000e+00> : vector<16x128xf32>
    %11 = tpu.matmul %9, %10, %cst_8 {dimension_numbers = #tpu.dot_dimension_numbers<[1], [0], [0], [1], [0, 0, 1, 1], [], []>} : vector<16x128xbf16>, vector<128x128xbf16>, vector<16x128xf32> -> vector<16x128xf32>
    %c0_9 = arith.constant 0 : index
    %c0_10 = arith.constant 0 : index
    %12 = vector.load %arg5[%c0_9, %c0_10] : memref<1x128xf32, #tpu.memory_space<vmem>>, vector<1x128xf32>
    %13 = vector.broadcast %12 : vector<1x128xf32> to vector<16x128xf32>
    %14 = arith.addf %11, %13 : vector<16x128xf32>
    %cst_11 = arith.constant 0.000000e+00 : f32
    %15 = vector.broadcast %cst_11 : f32 to vector<16x128xf32>
    %16 = arith.maximumf %14, %15 : vector<16x128xf32>
    %c0_12 = arith.constant 0 : index
    %c0_13 = arith.constant 0 : index
    %17 = vector.load %arg6[%c0_12, %c0_13] : memref<1x128xf32, #tpu.memory_space<vmem>>, vector<1x128xf32>
    %18 = vector.broadcast %17 : vector<1x128xf32> to vector<16x128xf32>
    %19 = arith.addf %16, %18 : vector<16x128xf32>
    %cst_14 = arith.constant dense<0xFF800000> : vector<16xf32>
    %20 = vector.multi_reduction <maximumf>, %19, %cst_14 [1] : vector<16x128xf32> to vector<16xf32>
    %21 = vector.shape_cast %20 : vector<16xf32> to vector<16x1xf32>
    %22 = vector.broadcast %21 : vector<16x1xf32> to vector<16x128xf32>
    %23 = arith.subf %19, %22 : vector<16x128xf32>
    %24 = math.exp %23 : vector<16x128xf32>
    %cst_15 = arith.constant dense<0.000000e+00> : vector<16xf32>
    %25 = vector.multi_reduction <add>, %24, %cst_15 [1] : vector<16x128xf32> to vector<16xf32>
    %26 = vector.shape_cast %25 : vector<16xf32> to vector<16x1xf32>
    %27 = math.log %26 : vector<16x1xf32>
    %28 = vector.broadcast %27 : vector<16x1xf32> to vector<16x128xf32>
    %29 = arith.subf %23, %28 : vector<16x128xf32>
    %c0_16 = arith.constant 0 : index
    %c0_17 = arith.constant 0 : index
    %30 = vector.load %arg7[%c0_16, %c0_17] : memref<16x128xf32, #tpu.memory_space<vmem>>, vector<16x128xf32>
    tpu.vector_store %arg7[%c0_16, %c0_17], %29 {strides = array<i32>} : memref<16x128xf32, #tpu.memory_space<vmem>>, vector<16x128xf32>,
    return
  }
  func.func @transform_0(%arg0: i32) -> (i32, i32) {
    %c0_i32 = arith.constant 0 : i32
    %c0_i32_0 = arith.constant 0 : i32
    return %arg0, %c0_i32 : i32, i32
  }
  func.func @transform_1(%arg0: i32) -> (i32, i32) {
    %c0_i32 = arith.constant 0 : i32
    %c0_i32_0 = arith.constant 0 : i32
    %c0_i32_1 = arith.constant 0 : i32
    return %c0_i32, %c0_i32_0 : i32, i32
  }
  func.func @transform_2(%arg0: i32) -> (i32, i32) {
    %c0_i32 = arith.constant 0 : i32
    %c0_i32_0 = arith.constant 0 : i32
    %c0_i32_1 = arith.constant 0 : i32
    return %c0_i32, %c0_i32_0 : i32, i32
  }
  func.func @transform_3(%arg0: i32) -> (i32, i32) {
    %c0_i32 = arith.constant 0 : i32
    %c0_i32_0 = arith.constant 0 : i32
    %c0_i32_1 = arith.constant 0 : i32
    return %c0_i32, %c0_i32_0 : i32, i32
  }
  func.func @transform_4(%arg0: i32) -> (i32, i32) {
    %c0_i32 = arith.constant 0 : i32
    %c0_i32_0 = arith.constant 0 : i32
    %c0_i32_1 = arith.constant 0 : i32
    return %c0_i32, %c0_i32_0 : i32, i32
  }
  func.func @transform_5(%arg0: i32) -> (i32, i32) {
    %c0_i32 = arith.constant 0 : i32
    %c0_i32_0 = arith.constant 0 : i32
    %c0_i32_1 = arith.constant 0 : i32
    return %c0_i32, %c0_i32_0 : i32, i32
  }
  func.func @transform_6(%arg0: i32) -> (i32, i32) {
    %c0_i32 = arith.constant 0 : i32
    %c0_i32_0 = arith.constant 0 : i32
    return %arg0, %c0_i32 : i32, i32
  }
}

</mosaic_0001>

<bundles_post_ra>
// kernel: tpu_custom_call.1
= control target key start
LH: loop header
LB: loop body
LE: loop exit
PB: predicated region body
PF: predicated region fallthrough
CT: control target
= control target key end

     0   :  { %11 = vsyncpa [#allocation3], 0  ;;  %s681_s0 = inlined_call_operand.hbm [shape: f32[16,256], index: 0, kind: input, shape index: {}]   ;;  %s682_s1 = inlined_call_operand.hbm [shape: bf16[256,128], index: 1, kind: input, shape index: {}]   ;;  %s683_s2 = inlined_call_operand.vmem [shape: f32[1,128], index: 2, kind: input, shape index: {}]   ;;  %s684_s3 = inlined_call_operand.hbm [shape: bf16[128,128], index: 3, kind: input, shape index: {}]   ;;  %s685_s4 = inlined_call_operand.vmem [shape: f32[1,128], index: 4, kind: input, shape index: {}]   ;;  %s686_s5 = inlined_call_operand.vmem [shape: f32[1,128], index: 5, kind: input, shape index: {}]   ;;  %s687_s6 = inlined_call_operand.hbm [shape: f32[16,128], index: 6, kind: output, shape index: {}]  }
   0x1   :  { %12 = vsyncpa [#allocation6], 0  ;;  %s31_s23 = sshll.u32 %s682_s1, 4  ;;  %s32_s23 = int_to_ptr.hbm [resolvable:$true] %s31_s23 }
   0x2   :  { %13 = vsyncpa [#allocation4], 0  ;;  %s615_s24 = smov [#allocation5]   ;;  %s18_s28 = sshll.u32 %s681_s0, 4  ;;  %s19_s28 = int_to_ptr.hbm [resolvable:$true] %s18_s28 }
   0x3   :  { %s33_s25 = sshll.u32 %s615_s24, 4  ;;  %s616_s29 = smov 64   ;;  %s34_s25 = int_to_ptr.vmem [resolvable:$true] %s33_s25 }
   0x4   :  { %s617_s30 = smov 4   ;;  %s618_s7 = smov [#allocation2]  }
   0x5   :  { %39 = dma.hbm_to_vmem [thread:$0]  %s32_s23, 2048, %s34_s25, [#allocation6], %s616_s29, %s616_s29, %s617_s30  }
   0x6   :  { %s20_s8 = sshll.u32 %s618_s7, 4  ;;  %s619_s9 = smov 256   ;;  %s21_s8 = int_to_ptr.vmem [resolvable:$true] %s20_s8 }
   0x7   :  { %s620_s10 = smov 16   ;;  %s46_s12 = sshll.u32 %s684_s3, 4  ;;  %s47_s12 = int_to_ptr.hbm [resolvable:$true] %s46_s12 }
   0x8   :  { %26 = dma.hbm_to_vmem [thread:$0]  %s19_s28, 512, %s21_s8, [#allocation3], %s619_s9, %s619_s9, %s620_s10  }
   0x9   :  { %s621_s13 = smov [#allocation7]  }
   0xa   :  { %s48_s14 = sshll.u32 %s621_s13, 4  ;;  %s49_s14 = int_to_ptr.vmem [resolvable:$true] %s48_s14 }
   0xb   :  { %54 = dma.hbm_to_vmem [thread:$0]  %s47_s12, 1024, %s49_s14, [#allocation6], %s616_s29, %s616_s29, %s617_s30  }
   0xc   :  { %609 = dma.done.wait [#allocation3], 512  }
   0xd   :  { %610 = vsyncadd [#allocation3], 4294966784 }
   0xe   :  { %611 = dma.done.wait [#allocation6], 3072  }
   0xf   :  { %612 = vsyncadd [#allocation6], 4294964224  ;;  %v475_v0 = vld [vmem:[#allocation5 + $0x38] sm:$0xff]  ;;  %v474_v2 = vld [vmem:[#allocation5 + $0x30] sm:$0xff]  ;;  %s358_s20 = sshll.u32 %s687_s6, 4  ;;  %s623_s21 = smov 128   ;;  %s359_s20 = int_to_ptr.hbm [resolvable:$true] %s358_s20 }
  0x10   :  { %v483_v1 = vld [vmem:[#allocation5 + $0x78] sm:$0xff]  ;;  %209 = vmatpush.bf16.msra.mxu0 %v475_v0  ;;  %v482_v3 = vld [vmem:[#allocation5 + $0x70] sm:$0xff]  ;;  %v473_v4 = vld [vmem:[#allocation5 + $0x28] sm:$0xff]  ;;  %s624_s22 = smov 8  }
  0x11   :  { %223 = vmatpush.bf16.msra.mxu1 %v483_v1  ;;  %v481_v5 = vld [vmem:[#allocation5 + $0x68] sm:$0xff]  ;;  %v491_v6 = vld [vmem:[#allocation7 + $0x38] sm:$0xff]  ;;  %v490_v7 = vld [vmem:[#allocation7 + $0x30] sm:$0xff] }
  0x12   :  { %308 = vmatpush.bf16.msra.mxu2 %v491_v6  ;;  %v472_v8 = vld [vmem:[#allocation5 + $0x20] sm:$0xff]  ;;  %v489_v10 = vld [vmem:[#allocation7 + $0x28] sm:$0xff]  ;;  %v471_v11 = vld [vmem:[#allocation5 + $0x18] sm:$0xff] }
  0x13   :  { %v480_v9 = vld [vmem:[#allocation5 + $0x60] sm:$0xff]  ;;  %v479_v12 = vld [vmem:[#allocation5 + $0x58] sm:$0xff]  ;;  %v470_v14 = vld [vmem:[#allocation5 + $0x10] sm:$0xff] }
  0x14   :  { %210 = vmatpush.bf16.msra.mxu0 %v474_v2  ;;  %v488_v13 = vld [vmem:[#allocation7 + $0x20] sm:$0xff]  ;;  %v478_v15 = vld [vmem:[#allocation5 + $0x50] sm:$0xff]  ;;  %v469_v16 = vld [vmem:[#allocation5 + $0x8] sm:$0xff] }
  0x15   :  { %224 = vmatpush.bf16.msra.mxu1 %v482_v3  ;;  %v477_v17 = vld [vmem:[#allocation5 + $0x48] sm:$0xff]  ;;  %v468_v18 = vld [vmem:[#allocation5] sm:$0xff]  ;;  %v73_v21 = vld [vmem:[#allocation2 + $0x10] sm:$0xff] }
  0x16   :  { %309 = vmatpush.bf16.msra.mxu2 %v490_v7  ;;  %v476_v19 = vld [vmem:[#allocation5 + $0x40] sm:$0xff]  ;;  %v72_v22 = vld [vmem:[#allocation2 + $0x8] sm:$0xff]  ;;  %v74_v23 = vld [vmem:[#allocation2 + $0x18] sm:$0xff] }
  0x17   :  { %v71_v20 = vld [vmem:[#allocation2] sm:$0xff]  ;;  %v76_v25 = vpack.c.bf16 %v74_v23, %v72_v22  ;;  %v487_v26 = vld [vmem:[#allocation7 + $0x18] sm:$0xff]  ;;  %v486_v27 = vld [vmem:[#allocation7 + $0x10] sm:$0xff] }
  0x18   :  { %211 = vmatpush.bf16.msra.mxu0 %v473_v4  ;;  %v75_v24 = vpack.c.bf16 %v73_v21, %v71_v20  ;;  %v485_v28 = vld [vmem:[#allocation7 + $0x8] sm:$0xff]  ;;  %v484_v29 = vld [vmem:[#allocation7] sm:$0xff] }
  0x19   :  { %225 = vmatpush.bf16.msra.mxu1 %v481_v5  ;;  %v502_v32 = vld [vmem:[%s683_s2] ss:$0 sm:$0xff]  ;;  %s622_s2 = smov [#allocation8]  }
  0x1a   :  { %310 = vmatpush.bf16.msra.mxu2 %v489_v10  ;;  %v503_v42 = vld [vmem:[%s685_s4] ss:$0 sm:$0xff]  ;;  %s356_s4 = sshll.u32 %s622_s2, 4  ;;  %s357_s4 = int_to_ptr.vmem [resolvable:$true] %s356_s4 }
  0x1b   :  { %v504_v45 = vld [vmem:[%s686_s5] ss:$0 sm:$0xff] }
  0x1c   :  { %212 = vmatpush.bf16.msra.mxu0 %v472_v8 }
  0x1d   :  { %226 = vmatpush.bf16.msra.mxu1 %v480_v9 }
  0x1e   :  { %311 = vmatpush.bf16.msra.mxu2 %v488_v13 }
  0x20   :  { %213 = vmatpush.bf16.msra.mxu0 %v471_v11 }
  0x21   :  { %227 = vmatpush.bf16.msra.mxu1 %v479_v12 }
  0x22   :  { %312 = vmatpush.bf16.msra.mxu2 %v487_v26 }
  0x24   :  { %214 = vmatpush.bf16.msra.mxu0 %v470_v14 }
  0x25   :  { %228 = vmatpush.bf16.msra.mxu1 %v478_v15 }
  0x26   :  { %313 = vmatpush.bf16.msra.mxu2 %v486_v27 }
  0x28   :  { %215 = vmatpush.bf16.msra.mxu0 %v469_v16 }
  0x29   :  { %229 = vmatpush.bf16.msra.mxu1 %v477_v17 }
  0x2a   :  { %314 = vmatpush.bf16.msra.mxu2 %v485_v28 }
  0x2c   :  { %216 = vmatpush.bf16.msra.mxu0 %v468_v18 }
  0x2d   :  { %230 = vmatpush.bf16.msra.mxu1 %v476_v19 }
  0x2e   :  { %315 = vmatpush.bf16.msra.mxu2 %v484_v29 }
  0x2f   :  { %217 = vmatmul.bf16.vlgmr.msra.gmra.mxu0 %v75_v24 }
  0x30   :  { %231 = vmatmul.bf16.vlgmr.msra.gmra.mxu1 %v76_v25 }
  0xac   :  { %v218_v30 = vpop.f32.mrf.mxu0 }
  0xad   :  { %v232_v31 = vpop.f32.mrf.mxu1  ;;  %v219_v33 = vadd.f32 %v502_v32, %v218_v30 }
  0xaf   :  { %v233_v35 = vadd.f32 %v232_v31, %v219_v33 }
  0xb1   :  { %v237_v39 = vmax.f32 %v233_v35, 0.0 }
  0xb4   :  { %v220_v34 = vpop.f32.mrf.mxu0 }
  0xb5   :  { %v221_v36 = vadd.f32 %v502_v32, %v220_v34  ;;  %v234_v37 = vpop.f32.mrf.mxu1 }
  0xb7   :  { %v235_v38 = vadd.f32 %v234_v37, %v221_v36 }
  0xb9   :  { %v238_v40 = vmax.f32 %v235_v38, 0.0 }
  0xbb   :  { %v239_v41 = vpack.c.bf16 %v238_v40, %v237_v39 }
  0xbd   :  { %316 = vmatmul.bf16.vlgmr.msra.gmra.mxu2 %v239_v41 }
 0x140   :  { %v317_v43 = vpop.f32.mrf.mxu2 }
 0x141   :  { %v318_v44 = vadd.f32 %v503_v42, %v317_v43 }
 0x143   :  { %v322_v46 = vmax.f32 %v318_v44, 0.0 }
 0x145   :  { %v328_v47 = vadd.f32 %v504_v45, %v322_v46 }
 0x147   :  { %330 = vmax.xlane.f32.xlu0 %v328_v47 }
 0x148   :  { %v319_v48 = vpop.f32.mrf.mxu2 }
 0x149   :  { %v320_v49 = vadd.f32 %v503_v42, %v319_v48 }
 0x14b   :  { %v323_v50 = vmax.f32 %v320_v49, 0.0 }
 0x14d   :  { %v329_v51 = vadd.f32 %v504_v45, %v323_v50 }
 0x14f   :  { %332 = vmax.xlane.f32.xlu0 %v329_v51 }
 0x1ba   :  { %v331_v52 = vpop.xlane.xlu0 %330 }
 0x1bb   :  { %v334_v53 = vsub.f32 %v328_v47, %v331_v52 }
 0x1bd   :  { %v336_v54 = vmul.f32 1.442695, %v334_v53 }
 0x1bf   :  { %505 = vpow2.f32 %v336_v54 }
 0x1c2   :  { %v333_v55 = vpop.xlane.xlu0 %332 }
 0x1c3   :  { %v335_v56 = vsub.f32 %v329_v51, %v333_v55 }
 0x1c5   :  { %v506_v57 = vpop.eup %505  ;;  %v338_v58 = vmul.f32 1.442695, %v335_v56 }
 0x1c6   :  { %340 = vadd.xlane.f32.xlu1 %v506_v57 }
 0x1c7   :  { %507 = vpow2.f32 %v338_v58 }
 0x1cd   :  { %v508_v59 = vpop.eup %507 }
 0x1ce   :  { %342 = vadd.xlane.f32.xlu1 %v508_v59 }
 0x239   :  { %v341_v60 = vpop.xlane.xlu1 %340 }
 0x23a   :  { %509 = vlog2.f32 %v341_v60 }
 0x240   :  { %v510_v61 = vpop.eup %509 }
 0x241   :  { %v345_v62 = vmul.f32 0.6931472, %v510_v61  ;;  %v343_v63 = vpop.xlane.xlu1 %342 }
 0x242   :  { %511 = vlog2.f32 %v343_v63 }
 0x243   :  { %v348_v0 = vsub.f32 %v334_v53, %v345_v62 }
 0x245   :  { %350 = vst [vmem:[#allocation8] sm:$0xff] %v348_v0 }
 0x248   :  { %v512_v1 = vpop.eup %511 }
 0x249   :  { %v347_v2 = vmul.f32 0.6931472, %v512_v1 }
 0x24b   :  { %v349_v3 = vsub.f32 %v335_v56, %v347_v2 }
 0x24d   :  { %351 = vst [vmem:[#allocation8 + $0x8] sm:$0xff] %v349_v3 }
 0x24e   :  { %364 = dma.vmem_to_hbm [thread:$0]  %s357_s4, 256, %s359_s20, [#allocation4], %s623_s21, %s623_s21, %s624_s22  }
 0x24f   :  { %613 = dma.done.wait [#allocation4], 256  }
 0x250   :  { %614 = vsyncadd [#allocation4], 4294967040 }
 0x251   :  { %369 = vsyncpa [#allocation3], 1 }
 0x252   :  { %370 = vsyncpa [#allocation6], 1 }
 0x253   :  { %371 = vsyncpa [#allocation4], 1 }

// kernel: tpu_custom_call.1
= control target key start
LH: loop header
LB: loop body
LE: loop exit
PB: predicated region body
PF: predicated region fallthrough
CT: control target
= control target key end

     0   :  { %11 = vsyncpa [#allocation3], 0  ;;  %s681_s0 = inlined_call_operand.hbm [shape: f32[16,256], index: 0, kind: input, shape index: {}]   ;;  %s682_s1 = inlined_call_operand.hbm [shape: bf16[256,128], index: 1, kind: input, shape index: {}]   ;;  %s683_s2 = inlined_call_operand.vmem [shape: f32[1,128], index: 2, kind: input, shape index: {}]   ;;  %s684_s3 = inlined_call_operand.hbm [shape: bf16[128,128], index: 3, kind: input, shape index: {}]   ;;  %s685_s4 = inlined_call_operand.vmem [shape: f32[1,128], index: 4, kind: input, shape index: {}]   ;;  %s686_s5 = inlined_call_operand.vmem [shape: f32[1,128], index: 5, kind: input, shape index: {}]   ;;  %s687_s6 = inlined_call_operand.hbm [shape: f32[16,128], index: 6, kind: output, shape index: {}]  }
   0x1   :  { %12 = vsyncpa [#allocation6], 0  ;;  %s31_s23 = sshll.u32 %s682_s1, 4  ;;  %s32_s23 = int_to_ptr.hbm [resolvable:$true] %s31_s23 }
   0x2   :  { %13 = vsyncpa [#allocation4], 0  ;;  %s615_s24 = smov [#allocation5]   ;;  %s18_s28 = sshll.u32 %s681_s0, 4  ;;  %s19_s28 = int_to_ptr.hbm [resolvable:$true] %s18_s28 }
   0x3   :  { %s33_s25 = sshll.u32 %s615_s24, 4  ;;  %s616_s29 = smov 64   ;;  %s34_s25 = int_to_ptr.vmem [resolvable:$true] %s33_s25 }
   0x4   :  { %s617_s30 = smov 4   ;;  %s618_s7 = smov [#allocation2]  }
   0x5   :  { %39 = dma.hbm_to_vmem [thread:$0]  %s32_s23, 2048, %s34_s25, [#allocation6], %s616_s29, %s616_s29, %s617_s30  }
   0x6   :  { %s20_s8 = sshll.u32 %s618_s7, 4  ;;  %s619_s9 = smov 256   ;;  %s21_s8 = int_to_ptr.vmem [resolvable:$true] %s20_s8 }
   0x7   :  { %s620_s10 = smov 16   ;;  %s46_s12 = sshll.u32 %s684_s3, 4  ;;  %s47_s12 = int_to_ptr.hbm [resolvable:$true] %s46_s12 }
   0x8   :  { %26 = dma.hbm_to_vmem [thread:$0]  %s19_s28, 512, %s21_s8, [#allocation3], %s619_s9, %s619_s9, %s620_s10  }
   0x9   :  { %s621_s13 = smov [#allocation7]  }
   0xa   :  { %s48_s14 = sshll.u32 %s621_s13, 4  ;;  %s49_s14 = int_to_ptr.vmem [resolvable:$true] %s48_s14 }
   0xb   :  { %54 = dma.hbm_to_vmem [thread:$0]  %s47_s12, 1024, %s49_s14, [#allocation6], %s616_s29, %s616_s29, %s617_s30  }
   0xc   :  { %609 = dma.done.wait [#allocation3], 512  }
   0xd   :  { %610 = vsyncadd [#allocation3], 4294966784 }
   0xe   :  { %611 = dma.done.wait [#allocation6], 3072  }
   0xf   :  { %612 = vsyncadd [#allocation6], 4294964224  ;;  %v475_v0 = vld [vmem:[#allocation5 + $0x38] sm:$0xff]  ;;  %v474_v2 = vld [vmem:[#allocation5 + $0x30] sm:$0xff]  ;;  %s358_s20 = sshll.u32 %s687_s6, 4  ;;  %s623_s21 = smov 128   ;;  %s359_s20 = int_to_ptr.hbm [resolvable:$true] %s358_s20 }
  0x10   :  { %v483_v1 = vld [vmem:[#allocation5 + $0x78] sm:$0xff]  ;;  %209 = vmatpush.bf16.msra.mxu0 %v475_v0  ;;  %v482_v3 = vld [vmem:[#allocation5 + $0x70] sm:$0xff]  ;;  %v473_v4 = vld [vmem:[#allocation5 + $0x28] sm:$0xff]  ;;  %s624_s22 = smov 8  }
  0x11   :  { %223 = vmatpush.bf16.msra.mxu1 %v483_v1  ;;  %v481_v5 = vld [vmem:[#allocation5 + $0x68] sm:$0xff]  ;;  %v491_v6 = vld [vmem:[#allocation7 + $0x38] sm:$0xff]  ;;  %v490_v7 = vld [vmem:[#allocation7 + $0x30] sm:$0xff] }
  0x12   :  { %308 = vmatpush.bf16.msra.mxu2 %v491_v6  ;;  %v472_v8 = vld [vmem:[#allocation5 + $0x20] sm:$0xff]  ;;  %v489_v10 = vld [vmem:[#allocation7 + $0x28] sm:$0xff]  ;;  %v471_v11 = vld [vmem:[#allocation5 + $0x18] sm:$0xff] }
  0x13   :  { %v480_v9 = vld [vmem:[#allocation5 + $0x60] sm:$0xff]  ;;  %v479_v12 = vld [vmem:[#allocation5 + $0x58] sm:$0xff]  ;;  %v470_v14 = vld [vmem:[#allocation5 + $0x10] sm:$0xff] }
  0x14   :  { %210 = vmatpush.bf16.msra.mxu0 %v474_v2  ;;  %v488_v13 = vld [vmem:[#allocation7 + $0x20] sm:$0xff]  ;;  %v478_v15 = vld [vmem:[#allocation5 + $0x50] sm:$0xff]  ;;  %v469_v16 = vld [vmem:[#allocation5 + $0x8] sm:$0xff] }
  0x15   :  { %224 = vmatpush.bf16.msra.mxu1 %v482_v3  ;;  %v477_v17 = vld [vmem:[#allocation5 + $0x48] sm:$0xff]  ;;  %v468_v18 = vld [vmem:[#allocation5] sm:$0xff]  ;;  %v73_v21 = vld [vmem:[#allocation2 + $0x10] sm:$0xff] }
  0x16   :  { %309 = vmatpush.bf16.msra.mxu2 %v490_v7  ;;  %v476_v19 = vld [vmem:[#allocation5 + $0x40] sm:$0xff]  ;;  %v72_v22 = vld [vmem:[#allocation2 + $0x8] sm:$0xff]  ;;  %v74_v23 = vld [vmem:[#allocation2 + $0x18] sm:$0xff] }
  0x17   :  { %v71_v20 = vld [vmem:[#allocation2] sm:$0xff]  ;;  %v76_v25 = vpack.c.bf16 %v74_v23, %v72_v22  ;;  %v487_v26 = vld [vmem:[#allocation7 + $0x18] sm:$0xff]  ;;  %v486_v27 = vld [vmem:[#allocation7 + $0x10] sm:$0xff] }
  0x18   :  { %211 = vmatpush.bf16.msra.mxu0 %v473_v4  ;;  %v75_v24 = vpack.c.bf16 %v73_v21, %v71_v20  ;;  %v485_v28 = vld [vmem:[#allocation7 + $0x8] sm:$0xff]  ;;  %v484_v29 = vld [vmem:[#allocation7] sm:$0xff] }
  0x19   :  { %225 = vmatpush.bf16.msra.mxu1 %v481_v5  ;;  %v502_v32 = vld [vmem:[%s683_s2] ss:$0 sm:$0xff]  ;;  %s622_s2 = smov [#allocation8]  }
  0x1a   :  { %310 = vmatpush.bf16.msra.mxu2 %v489_v10  ;;  %v503_v42 = vld [vmem:[%s685_s4] ss:$0 sm:$0xff]  ;;  %s356_s4 = sshll.u32 %s622_s2, 4  ;;  %s357_s4 = int_to_ptr.vmem [resolvable:$true] %s356_s4 }
  0x1b   :  { %v504_v45 = vld [vmem:[%s686_s5] ss:$0 sm:$0xff] }
  0x1c   :  { %212 = vmatpush.bf16.msra.mxu0 %v472_v8 }
  0x1d   :  { %226 = vmatpush.bf16.msra.mxu1 %v480_v9 }
  0x1e   :  { %311 = vmatpush.bf16.msra.mxu2 %v488_v13 }
  0x20   :  { %213 = vmatpush.bf16.msra.mxu0 %v471_v11 }
  0x21   :  { %227 = vmatpush.bf16.msra.mxu1 %v479_v12 }
  0x22   :  { %312 = vmatpush.bf16.msra.mxu2 %v487_v26 }
  0x24   :  { %214 = vmatpush.bf16.msra.mxu0 %v470_v14 }
  0x25   :  { %228 = vmatpush.bf16.msra.mxu1 %v478_v15 }
  0x26   :  { %313 = vmatpush.bf16.msra.mxu2 %v486_v27 }
  0x28   :  { %215 = vmatpush.bf16.msra.mxu0 %v469_v16 }
  0x29   :  { %229 = vmatpush.bf16.msra.mxu1 %v477_v17 }
  0x2a   :  { %314 = vmatpush.bf16.msra.mxu2 %v485_v28 }
  0x2c   :  { %216 = vmatpush.bf16.msra.mxu0 %v468_v18 }
  0x2d   :  { %230 = vmatpush.bf16.msra.mxu1 %v476_v19 }
  0x2e   :  { %315 = vmatpush.bf16.msra.mxu2 %v484_v29 }
  0x2f   :  { %217 = vmatmul.bf16.vlgmr.msra.gmra.mxu0 %v75_v24 }
  0x30   :  { %231 = vmatmul.bf16.vlgmr.msra.gmra.mxu1 %v76_v25 }
  0xac   :  { %v218_v30 = vpop.f32.mrf.mxu0 }
  0xad   :  { %v232_v31 = vpop.f32.mrf.mxu1  ;;  %v219_v33 = vadd.f32 %v502_v32, %v218_v30 }
  0xaf   :  { %v233_v35 = vadd.f32 %v232_v31, %v219_v33 }
  0xb1   :  { %v237_v39 = vmax.f32 %v233_v35, 0.0 }
  0xb4   :  { %v220_v34 = vpop.f32.mrf.mxu0 }
  0xb5   :  { %v221_v36 = vadd.f32 %v502_v32, %v220_v34  ;;  %v234_v37 = vpop.f32.mrf.mxu1 }
  0xb7   :  { %v235_v38 = vadd.f32 %v234_v37, %v221_v36 }
  0xb9   :  { %v238_v40 = vmax.f32 %v235_v38, 0.0 }
  0xbb   :  { %v239_v41 = vpack.c.bf16 %v238_v40, %v237_v39 }
  0xbd   :  { %316 = vmatmul.bf16.vlgmr.msra.gmra.mxu2 %v239_v41 }
 0x140   :  { %v317_v43 = vpop.f32.mrf.mxu2 }
 0x141   :  { %v318_v44 = vadd.f32 %v503_v42, %v317_v43 }
 0x143   :  { %v322_v46 = vmax.f32 %v318_v44, 0.0 }
 0x145   :  { %v328_v47 = vadd.f32 %v504_v45, %v322_v46 }
 0x147   :  { %330 = vmax.xlane.f32.xlu0 %v328_v47 }
 0x148   :  { %v319_v48 = vpop.f32.mrf.mxu2 }
 0x149   :  { %v320_v49 = vadd.f32 %v503_v42, %v319_v48 }
 0x14b   :  { %v323_v50 = vmax.f32 %v320_v49, 0.0 }
 0x14d   :  { %v329_v51 = vadd.f32 %v504_v45, %v323_v50 }
 0x14f   :  { %332 = vmax.xlane.f32.xlu0 %v329_v51 }
 0x1ba   :  { %v331_v52 = vpop.xlane.xlu0 %330 }
 0x1bb   :  { %v334_v53 = vsub.f32 %v328_v47, %v331_v52 }
 0x1bd   :  { %v336_v54 = vmul.f32 1.442695, %v334_v53 }
 0x1bf   :  { %505 = vpow2.f32 %v336_v54 }
 0x1c2   :  { %v333_v55 = vpop.xlane.xlu0 %332 }
 0x1c3   :  { %v335_v56 = vsub.f32 %v329_v51, %v333_v55 }
 0x1c5   :  { %v506_v57 = vpop.eup %505  ;;  %v338_v58 = vmul.f32 1.442695, %v335_v56 }
 0x1c6   :  { %340 = vadd.xlane.f32.xlu1 %v506_v57 }
 0x1c7   :  { %507 = vpow2.f32 %v338_v58 }
 0x1cd   :  { %v508_v59 = vpop.eup %507 }
 0x1ce   :  { %342 = vadd.xlane.f32.xlu1 %v508_v59 }
 0x239   :  { %v341_v60 = vpop.xlane.xlu1 %340 }
 0x23a   :  { %509 = vlog2.f32 %v341_v60 }
 0x240   :  { %v510_v61 = vpop.eup %509 }
 0x241   :  { %v345_v62 = vmul.f32 0.6931472, %v510_v61  ;;  %v343_v63 = vpop.xlane.xlu1 %342 }
 0x242   :  { %511 = vlog2.f32 %v343_v63 }
 0x243   :  { %v348_v0 = vsub.f32 %v334_v53, %v345_v62 }
 0x245   :  { %350 = vst [vmem:[#allocation8] sm:$0xff] %v348_v0 }
 0x248   :  { %v512_v1 = vpop.eup %511 }
 0x249   :  { %v347_v2 = vmul.f32 0.6931472, %v512_v1 }
 0x24b   :  { %v349_v3 = vsub.f32 %v335_v56, %v347_v2 }
 0x24d   :  { %351 = vst [vmem:[#allocation8 + $0x8] sm:$0xff] %v349_v3 }
 0x24e   :  { %364 = dma.vmem_to_hbm [thread:$0]  %s357_s4, 256, %s359_s20, [#allocation4], %s623_s21, %s623_s21, %s624_s22  }
 0x24f   :  { %613 = dma.done.wait [#allocation4], 256  }
 0x250   :  { %614 = vsyncadd [#allocation4], 4294967040 }
 0x251   :  { %369 = vsyncpa [#allocation3], 1 }
 0x252   :  { %370 = vsyncpa [#allocation6], 1 }
 0x253   :  { %371 = vsyncpa [#allocation4], 1 }

</bundles_post_ra>
